<compile_context>
chip_gen: v7x
topology: tpu7x:2x2x1
jax: 0.10.0
libtpu: 0.0.40
codegen_flags: <defaults>
</compile_context>

<pallas_src>
import functools

import jax
import jax.numpy as jnp
from jax import lax
from jax.experimental import pallas as pl
from jax.experimental.pallas import tpu as pltpu

# --- physics constants (deterministic, baked into the kernel) ---------------
NU = 0.05            # diffusion coefficient
K_REACT = 0.30       # reaction rate
CX, CY = 1.0, 0.5    # constant advecting velocity
DX = DY = 1.0 / 16.0

# --- folded 5-point stencil coefficients (computed in Python, not in-kernel) -
#   out = C_XP*xp + C_XM*xm + C_YP*yp + C_YM*ym
#         + (C_CENTER - K_REACT*phi)*phi + force
C_XP = NU / DX**2 - 0.5 * CX / DX
C_XM = NU / DX**2 + 0.5 * CX / DX
C_YP = NU / DY**2 - 0.5 * CY / DY
C_YM = NU / DY**2 + 0.5 * CY / DY
C_CENTER = K_REACT - 2.0 * NU * (1.0 / DX**2 + 1.0 / DY**2)


# ----------------------------- kernels ---------------------------------------
def rhs_kernel_3d(phi_ref, force_ref, out_ref):
    """Fused RHS on a (B, H, W) tile (lane-dense when W % 128 == 0)."""
    phi = phi_ref[...]                                    # (B, H, W)
    # term-by-term accumulation: at most ~2 full-tile temporaries live
    acc = C_XP * jnp.roll(phi, -1, axis=2)                # phi[., i, j+1]
    acc = acc + C_XM * jnp.roll(phi, 1, axis=2)           # phi[., i, j-1]
    acc = acc + C_YP * jnp.roll(phi, -1, axis=1)          # phi[., i+1, j]
    acc = acc + C_YM * jnp.roll(phi, 1, axis=1)           # phi[., i-1, j]
    acc = acc + (C_CENTER - K_REACT * phi) * phi          # center + reaction
    out_ref[...] = acc + force_ref[...][None, :, :]       # force (VMEM-resident)


def rhs_kernel_flat(phi_ref, force_ref, out_ref, *, W):
    """Fused RHS on a (B, H*W) tile (lane-dense layout for small W).

    Row-major flattening: lane index k = i*W + j.
      * i+/-1 neighbours are lane rolls by -/+W; the wrap across the H*W
        boundary is exactly the periodic wrap in H.
      * j+/-1 neighbours are lane rolls by -/+1 with a masked seam fix at the
        W-row boundary (periodic wrap in W).
    """
    phi = phi_ref[...]                                    # (B, H*W)
    jj = lax.broadcasted_iota(jnp.int32, phi.shape, 1) % W

    xp = jnp.where(jj == W - 1,
                   jnp.roll(phi, W - 1, axis=1),          # phi[., i, 0]
                   jnp.roll(phi, -1, axis=1))             # phi[., i, j+1]
    acc = C_XP * xp
    xm = jnp.where(jj == 0,
                   jnp.roll(phi, -(W - 1), axis=1),       # phi[., i, W-1]
                   jnp.roll(phi, 1, axis=1))              # phi[., i, j-1]
    acc = acc + C_XM * xm
    acc = acc + C_YP * jnp.roll(phi, -W, axis=1)          # phi[., i+1, j]
    acc = acc + C_YM * jnp.roll(phi, W, axis=1)           # phi[., i-1, j]
    acc = acc + (C_CENTER - K_REACT * phi) * phi          # center + reaction
    out_ref[...] = acc + force_ref[...]                   # (1, H*W) broadcast


# ----------------------------- tiling plan ------------------------------------
def _vmem_capacity_bytes():
    try:
        return int(pltpu.get_tpu_info().vmem_capacity_bytes)
    except Exception:
        return 64 * 1024 * 1024   # conservative: v7x per-TensorCore VMEM


def _plan(M, H, W, itemsize):
    """Choose layout (flattened vs 3-D), batch B, padded M, grid, vmem limit."""
    HW = H * W
    slab = HW * itemsize
    vmem_cap = _vmem_capacity_bytes()
    budget = (vmem_cap * 85) // 100          # leave headroom below the cap
    # ~9 live tile-sized buffers: 2x dbl-buffered in + 2x dbl-buffered out
    # + ~4 in-kernel temporaries / compiler scratch + margin.
    tile_target = min(16 << 20, budget // 9)

    if slab > tile_target:
        # TODO(synk): spatial (H, W) tiling with halo exchange is required
        # once a single periodic slab no longer fits the per-tile VMEM budget.
        raise ValueError(
            f"single (H, W)={H}x{W} slab ({slab} B) exceeds the per-tile VMEM "
            f"budget ({tile_target} B); spatial halo-exchange tiling not "
            f"implemented")

    # lane-dense flattened layout only pays off when W is not lane-aligned
    flatten = (W % 128 != 0) and (HW % 128 == 0)
    q = 8 if flatten else 1                  # sublane quantum for (M, H*W) blocks
    if flatten and (tile_target // slab) < q:
        flatten, q = False, 1                # cannot batch 8 slabs -> 3-D blocks

    b_vmem = max(1, tile_target // slab)     # VMEM-driven cap
    b_grid = max(1, -(-M // 4))              # >= 4 grid steps (2 per v7x TC)
    B = max(1, min(M, b_vmem, b_grid))
    if q > 1:
        # sublane alignment for the flattened layout takes priority over the
        # >=4-steps preference at tiny M
        B = (B // q) * q if B >= q else q

    M_pad = -(-M // B) * B
    grid = M_pad // B

    tile = B * slab
    needed = 9 * tile + slab + (2 << 20)
    vmem_limit = int(min(budget, max(needed, 16 << 20)))
    return flatten, B, M_pad, grid, vmem_limit


# ----------------------------- wrapper ----------------------------------------
def rhs_pallas(phi, force_field):
    """phi: (N, C, H, W); force_field: (H, W) — returns (N, C, H, W)."""
    N, C, H, W = phi.shape
    M = N * C
    HW = H * W
    dtype = phi.dtype
    flatten, B, M_pad, grid_len, vmem_limit = _plan(M, H, W, dtype.itemsize)

    cost = pl.CostEstimate(
        flops=13 * M_pad * HW,
        transcendentals=0,
        bytes_accessed=2 * M_pad * HW * dtype.itemsize + HW * dtype.itemsize)
    cparams = pltpu.CompilerParams(
        dimension_semantics=("parallel",),
        vmem_limit_bytes=vmem_limit)

    if flatten:
        x = phi.reshape(M, HW)
        if M_pad > M:
            x = jnp.pad(x, ((0, M_pad - M), (0, 0)))
        f = force_field.reshape(1, HW)
        out = pl.pallas_call(
            functools.partial(rhs_kernel_flat, W=W),
            out_shape=jax.ShapeDtypeStruct((M_pad, HW), dtype),
            grid_spec=pl.GridSpec(
                grid=(grid_len,),
                in_specs=[
                    pl.BlockSpec((B, HW), lambda i: (i, 0)),
                    # force: constant block index -> DMA'd once, VMEM-resident
                    pl.BlockSpec((1, HW), lambda i: (0, 0)),
                ],
                out_specs=pl.BlockSpec((B, HW), lambda i: (i, 0)),
            ),
            compiler_params=cparams,
            cost_estimate=cost,
        )(x, f)
    else:
        x = phi.reshape(M, H, W)
        if M_pad > M:
            x = jnp.pad(x, ((0, M_pad - M), (0, 0), (0, 0)))
        out = pl.pallas_call(
            rhs_kernel_3d,
            out_shape=jax.ShapeDtypeStruct((M_pad, H, W), dtype),
            grid_spec=pl.GridSpec(
                grid=(grid_len,),
                in_specs=[
                    pl.BlockSpec((B, H, W), lambda i: (i, 0, 0)),
                    pl.BlockSpec((H, W), lambda i: (0, 0)),
                ],
                out_specs=pl.BlockSpec((B, H, W), lambda i: (i, 0, 0)),
            ),
            compiler_params=cparams,
            cost_estimate=cost,
        )(x, force_field)

    return out[:M].reshape(N, C, H, W)


# ----------------------------- reference --------------------------------------
def rhs_reference(phi, force_field):
    """Plain-JAX reference mirroring RHS.forward's sum of components."""
    xp = jnp.roll(phi, -1, axis=3)
    xm = jnp.roll(phi, 1, axis=3)
    yp = jnp.roll(phi, -1, axis=2)
    ym = jnp.roll(phi, 1, axis=2)
    lap = (xp + xm - 2 * phi) / DX**2 + (yp + ym - 2 * phi) / DY**2
    dphidx = (xp - xm) * (0.5 / DX)
    dphidy = (yp - ym) * (0.5 / DY)
    result = jnp.zeros_like(phi)
    result = result + (-(CX * dphidx + CY * dphidy))        # advection
    result = result + K_REACT * phi * (1.0 - phi)           # reaction
    result = result + NU * lap                               # diffusion
    result = result + force_field[None, None, :, :]          # force
    return result


if __name__ == "__main__":
    key = jax.random.PRNGKey(0)
    N, C, H, W = 2, 4, 16, 16

    # solution field of the simulation state
    phi = jax.random.normal(key, (N, C, H, W), dtype=jnp.float32)

    # deterministic sinusoidal forcing field (H, W) — single HBM copy
    ii = jnp.arange(H, dtype=jnp.float32)[:, None]
    jj = jnp.arange(W, dtype=jnp.float32)[None, :]
    force_field = (0.1 * jnp.sin(2.0 * jnp.pi * ii / H)
                   * jnp.cos(2.0 * jnp.pi * jj / W)).astype(jnp.float32)

    out = rhs_pallas(phi, force_field)
    out = jax.block_until_ready(out)

    ref = rhs_reference(phi, force_field)
    assert out.shape == (N, C, H, W) and out.dtype == jnp.float32
    assert jnp.allclose(out, ref, atol=1e-3, rtol=1e-4), "mismatch vs reference"

    print("KERNEL_OK")
</pallas_src>

<mosaic_0001>
module attributes {stable_mosaic.version = 11 : i64} {
  func.func @rhs_kernel_flat(%arg0: i32, %arg1: memref<8x256xf32, #tpu.memory_space<vmem>>, %arg2: memref<1x256xf32, #tpu.memory_space<vmem>>, %arg3: memref<8x256xf32, #tpu.memory_space<vmem>>) attributes {dimension_semantics = [#tpu.dimension_semantics<parallel>], iteration_bounds = array<i64: 1>, scalar_prefetch = 0 : i64, scratch_operands = 0 : i64, tpu.core_type = #tpu.core_type<tc>, window_params = [{transform_indices = @transform_0, window_bounds = array<i64: 8, 256>}, {pipeline_mode = #tpu.pipeline_mode<synchronous>, transform_indices = @transform_1, window_bounds = array<i64: 1, 256>}, {transform_indices = @transform_2, window_bounds = array<i64: 8, 256>}]} {
    %c0 = arith.constant 0 : index
    %c0_0 = arith.constant 0 : index
    %0 = vector.load %arg1[%c0, %c0_0] : memref<8x256xf32, #tpu.memory_space<vmem>>, vector<8x256xf32>
    %1 = tpu.iota {dimensions = array<i32: 1>} : vector<8x256xi32>
    %c16_i32 = arith.constant 16 : i32
    %c0_i32 = arith.constant 0 : i32
    %2 = arith.cmpi eq, %c16_i32, %c0_i32 : i32
    %c1_i32 = arith.constant 1 : i32
    %3 = arith.select %2, %c1_i32, %c16_i32 : i32
    %4 = vector.broadcast %3 : i32 to vector<8x256xi32>
    %5 = arith.remsi %1, %4 : vector<8x256xi32>
    %c0_i32_1 = arith.constant 0 : i32
    %6 = vector.broadcast %c0_i32_1 : i32 to vector<8x256xi32>
    %7 = arith.cmpi ne, %5, %6 : vector<8x256xi32>
    %c0_i32_2 = arith.constant 0 : i32
    %8 = vector.broadcast %c0_i32_2 : i32 to vector<8x256xi32>
    %9 = arith.cmpi slt, %5, %8 : vector<8x256xi32>
    %c0_i32_3 = arith.constant 0 : i32
    %10 = arith.cmpi slt, %3, %c0_i32_3 : i32
    %11 = vector.broadcast %10 : i1 to vector<8x256xi1>
    %12 = vector.broadcast %11 : vector<8x256xi1> to vector<8x256xi1>
    %13 = arith.xori %9, %12 : vector<8x256xi1>
    %14 = arith.andi %13, %7 : vector<8x256xi1>
    %15 = vector.broadcast %3 : i32 to vector<8x256xi32>
    %16 = arith.addi %5, %15 : vector<8x256xi32>
    %17 = arith.select %14, %16, %5 : vector<8x256xi1>, vector<8x256xi32>
    %c15_i32 = arith.constant 15 : i32
    %18 = vector.broadcast %c15_i32 : i32 to vector<8x256xi32>
    %19 = arith.cmpi eq, %17, %18 : vector<8x256xi32>
    %20 = vector.extract_strided_slice %0 {offsets = [0, 241], sizes = [8, 15], strides = [1, 1]} : vector<8x256xf32> to vector<8x15xf32>
    %21 = vector.extract_strided_slice %0 {offsets = [0, 0], sizes = [8, 241], strides = [1, 1]} : vector<8x256xf32> to vector<8x241xf32>
    %22 = tpu.concatenate %20, %21 in 1 : vector<8x15xf32>, vector<8x241xf32> -> vector<8x256xf32>
    %23 = vector.extract_strided_slice %0 {offsets = [0, 1], sizes = [8, 255], strides = [1, 1]} : vector<8x256xf32> to vector<8x255xf32>
    %24 = vector.extract_strided_slice %0 {offsets = [0, 0], sizes = [8, 1], strides = [1, 1]} : vector<8x256xf32> to vector<8x1xf32>
    %25 = tpu.concatenate %23, %24 in 1 : vector<8x255xf32>, vector<8x1xf32> -> vector<8x256xf32>
    %26 = arith.select %19, %22, %25 : vector<8x256xi1>, vector<8x256xf32>
    %cst = arith.constant 4.800000e+00 : f32
    %27 = vector.broadcast %cst : f32 to vector<8x256xf32>
    %28 = arith.mulf %27, %26 : vector<8x256xf32>
    %c0_i32_4 = arith.constant 0 : i32
    %29 = vector.broadcast %c0_i32_4 : i32 to vector<8x256xi32>
    %30 = arith.cmpi eq, %17, %29 : vector<8x256xi32>
    %31 = vector.extract_strided_slice %0 {offsets = [0, 15], sizes = [8, 241], strides = [1, 1]} : vector<8x256xf32> to vector<8x241xf32>
    %32 = vector.extract_strided_slice %0 {offsets = [0, 0], sizes = [8, 15], strides = [1, 1]} : vector<8x256xf32> to vector<8x15xf32>
    %33 = tpu.concatenate %31, %32 in 1 : vector<8x241xf32>, vector<8x15xf32> -> vector<8x256xf32>
    %34 = vector.extract_strided_slice %0 {offsets = [0, 255], sizes = [8, 1], strides = [1, 1]} : vector<8x256xf32> to vector<8x1xf32>
    %35 = vector.extract_strided_slice %0 {offsets = [0, 0], sizes = [8, 255], strides = [1, 1]} : vector<8x256xf32> to vector<8x255xf32>
    %36 = tpu.concatenate %34, %35 in 1 : vector<8x1xf32>, vector<8x255xf32> -> vector<8x256xf32>
    %37 = arith.select %30, %33, %36 : vector<8x256xi1>, vector<8x256xf32>
    %cst_5 = arith.constant 2.080000e+01 : f32
    %38 = vector.broadcast %cst_5 : f32 to vector<8x256xf32>
    %39 = arith.mulf %38, %37 : vector<8x256xf32>
    %40 = arith.addf %28, %39 : vector<8x256xf32>
    %41 = vector.extract_strided_slice %0 {offsets = [0, 16], sizes = [8, 240], strides = [1, 1]} : vector<8x256xf32> to vector<8x240xf32>
    %42 = vector.extract_strided_slice %0 {offsets = [0, 0], sizes = [8, 16], strides = [1, 1]} : vector<8x256xf32> to vector<8x16xf32>
    %43 = tpu.concatenate %41, %42 in 1 : vector<8x240xf32>, vector<8x16xf32> -> vector<8x256xf32>
    %cst_6 = arith.constant 8.800000e+00 : f32
    %44 = vector.broadcast %cst_6 : f32 to vector<8x256xf32>
    %45 = arith.mulf %44, %43 : vector<8x256xf32>
    %46 = arith.addf %40, %45 : vector<8x256xf32>
    %47 = vector.extract_strided_slice %0 {offsets = [0, 240], sizes = [8, 16], strides = [1, 1]} : vector<8x256xf32> to vector<8x16xf32>
    %48 = vector.extract_strided_slice %0 {offsets = [0, 0], sizes = [8, 240], strides = [1, 1]} : vector<8x256xf32> to vector<8x240xf32>
    %49 = tpu.concatenate %47, %48 in 1 : vector<8x16xf32>, vector<8x240xf32> -> vector<8x256xf32>
    %cst_7 = arith.constant 1.680000e+01 : f32
    %50 = vector.broadcast %cst_7 : f32 to vector<8x256xf32>
    %51 = arith.mulf %50, %49 : vector<8x256xf32>
    %52 = arith.addf %46, %51 : vector<8x256xf32>
    %cst_8 = arith.constant 3.000000e-01 : f32
    %53 = vector.broadcast %cst_8 : f32 to vector<8x256xf32>
    %54 = arith.mulf %53, %0 : vector<8x256xf32>
    %cst_9 = arith.constant -5.090000e+01 : f32
    %55 = vector.broadcast %cst_9 : f32 to vector<8x256xf32>
    %56 = arith.subf %55, %54 : vector<8x256xf32>
    %57 = arith.mulf %56, %0 : vector<8x256xf32>
    %58 = arith.addf %52, %57 : vector<8x256xf32>
    %c0_10 = arith.constant 0 : index
    %c0_11 = arith.constant 0 : index
    %59 = vector.load %arg2[%c0_10, %c0_11] : memref<1x256xf32, #tpu.memory_space<vmem>>, vector<1x256xf32>
    %60 = vector.broadcast %59 : vector<1x256xf32> to vector<8x256xf32>
    %61 = arith.addf %58, %60 : vector<8x256xf32>
    %c0_12 = arith.constant 0 : index
    %c0_13 = arith.constant 0 : index
    %62 = vector.load %arg3[%c0_12, %c0_13] : memref<8x256xf32, #tpu.memory_space<vmem>>, vector<8x256xf32>
    tpu.vector_store %arg3[%c0_12, %c0_13], %61 {strides = array<i32>} : memref<8x256xf32, #tpu.memory_space<vmem>>, vector<8x256xf32>,
    return
  }
  func.func @transform_0(%arg0: i32) -> (i32, i32) {
    %c0_i32 = arith.constant 0 : i32
    %c0_i32_0 = arith.constant 0 : i32
    return %arg0, %c0_i32 : i32, i32
  }
  func.func @transform_1(%arg0: i32) -> (i32, i32) {
    %c0_i32 = arith.constant 0 : i32
    %c0_i32_0 = arith.constant 0 : i32
    %c0_i32_1 = arith.constant 0 : i32
    return %c0_i32, %c0_i32_0 : i32, i32
  }
  func.func @transform_2(%arg0: i32) -> (i32, i32) {
    %c0_i32 = arith.constant 0 : i32
    %c0_i32_0 = arith.constant 0 : i32
    return %arg0, %c0_i32 : i32, i32
  }
}

</mosaic_0001>

<bundles_post_ra>
// kernel: tpu_custom_call.1
= control target key start
LH: loop header
LB: loop body
LE: loop exit
PB: predicated region body
PF: predicated region fallthrough
CT: control target
= control target key end

     0   :  { %7 = vsyncpa [#allocation3], 0  ;;  %s316_s0 = inlined_call_operand.hbm [shape: f32[8,256], index: 0, kind: input, shape index: {}]   ;;  %s317_s1 = inlined_call_operand.vmem [shape: f32[1,256], index: 1, kind: input, shape index: {}]   ;;  %s318_s2 = inlined_call_operand.hbm [shape: f32[8,256], index: 2, kind: output, shape index: {}]  }
   0x1   :  { %8 = vsyncpa [#allocation4], 0  ;;  %s232_s9 = smov [#allocation2]   ;;  %s184_s13 = scalar_lea.hbm %s316_s0, 256 }
   0x2   :  { %s15_s10 = sshll.u32 %s232_s9, 4  ;;  %p185_p0 = scmp.ne.s32.totalorder %s316_s0, %s184_s13  ;;  %s16_s10 = int_to_ptr.vmem [resolvable:$true] %s15_s10 }
   0x3   :  { %p188_p1 = scmp.lt.u32.totalorder %s184_s13, %s316_s0 }
   0x5   :  { %p190_p2 = pnand %p188_p1, %p185_p0 }
   0x7   :  { %193 = shalt.err (!%p190_p2)
}
   0x8   :  { %s194_s18 = scalar_lea.vmem %s16_s10, 256  ;;  %p199_p4 = scmp.lt.s32.totalorder %s16_s10, %s16_s10 }
   0x9   :  { %p195_p3 = scmp.ne.s32.totalorder %s16_s10, %s194_s18  ;;  %p200_p5 = scmp.lt.s32.totalorder %s194_s18, %s194_s18 }
   0xb   :  { %p201_p6 = por %p200_p5, %p199_p4 }
   0xd   :  { %p202_p7 = pnand %p201_p6, %p195_p3 }
   0xf   :  { %205 = shalt.err (!%p202_p7)
}
  0x10   :  { %18 = dma.hbm_to_vmem [thread:$0]  %s316_s0, 256, %s16_s10, [#allocation3]  }
  0x11   :  { %228 = dma.done.wait [#allocation3], 256  }
  0x12   :  { %229 = vsyncadd [#allocation3], 4294967040  ;;  %v267_v0 = vld [vmem:[#allocation2 + $0x8] sm:$0xff]  ;;  %v269_v1 = vld [vmem:[#allocation2] sm:$0xff]  ;;  %s233_s21 = smov 15   ;;  %s234_s22 = smov 127   ;;  %v26_v2 = vlaneseq }
  0x13   :  { %56 = vrot.lane.b32.xlu0 %v267_v0, %s233_s21  ;;  %67 = vrot.lane.b32.xlu1 %v269_v1, %s234_s22  ;;  %s235_s23 = smov 113   ;;  %s236_s0 = smov 1   ;;  %vm71_vm0 = vcmask 1039360   ;;  %vm62_vm1 = vcmask 121856   ;;  %vm87_vm4 = vcmask 924672   ;;  %vm98_vm5 = vcmask 7168  }
  0x14   :  { %s237_s24 = smov 112   ;;  %s238_s25 = smov 16   ;;  %v27_v3 = vand.u32 127, %v26_v2  ;;  %v138_v23 = vmul.f32 0.3, %v267_v0  ;;  %vm113_vm8 = vcmask 916480  }
  0x15   :  { %v137_v24 = vmul.f32 0.3, %v269_v1  ;;  %vm128_vm9 = vcmask 130048   ;;  %v148_v37 = vshrl.u32 %v26_v2, 7  ;;  %v145_v54 = vld [vmem:[%s317_s1] sm:$0x3] }
  0x16   :  { %v28_v6 = vadd.s32 128, %v27_v3  ;;  %v33_v8 = vand.u32 15, %v27_v3  ;;  %v140_v40 = vsub.f32 -50.9, %v138_v23  ;;  %s239_s28 = smov [#allocation5]  }
  0x17   :  { %69 = vrot.lane.b32.xlu1 %v267_v0, %s234_s22  ;;  %60 = vrot.lane.b32.xlu0 %v269_v1, %s233_s21  ;;  %v139_v41 = vsub.f32 -50.9, %v137_v24  ;;  %v149_v48 = vsub.s32 0, %v148_v37  ;;  %v153_v49 = vsub.s32 1, %v148_v37  ;;  %s167_s29 = sshll.u32 %s239_s28, 4  ;;  %s168_s29 = int_to_ptr.vmem [resolvable:$true] %s167_s29 }
  0x18   :  { %v40_v9 = vand.u32 15, %v28_v6  ;;  %vm283_vm2 = vcmp.eq.s32.totalorder %v33_v8, 15  ;;  %vm81_vm6 = vcmp.eq.s32.totalorder %v33_v8, 0  ;;  %v142_v50 = vmul.f32 %v140_v40, %v267_v0  ;;  %s206_s30 = scalar_lea.vmem %s168_s29, 256  ;;  %p211_p9 = scmp.lt.s32.totalorder %s168_s29, %s168_s29 }
  0x19   :  { %v141_v53 = vmul.f32 %v139_v41, %v269_v1  ;;  %v150_v61 = vrot.slane %v145_v54, %v149_v48  ;;  %v154_v62 = vrot.slane %v145_v54, %v153_v49  ;;  %p207_p8 = scmp.ne.s32.totalorder %s168_s29, %s206_s30  ;;  %p212_p10 = scmp.lt.s32.totalorder %s206_s30, %s206_s30 }
  0x1a   :  { %vm287_vm3 = vcmp.eq.s32.totalorder %v40_v9, 15  ;;  %vm82_vm7 = vcmp.eq.s32.totalorder %v40_v9, 0 }
  0x1b   :  { %85 = vrot.lane.b32.xlu1 %v267_v0, %s235_s23  ;;  %83 = vrot.lane.b32.xlu0 %v269_v1, %s235_s23  ;;  %p213_p11 = por %p212_p10, %p211_p9 }
  0x1d   :  { %p214_p12 = pnand %p213_p11, %p207_p8 }
  0x1f   :  { %96 = vrot.lane.b32.xlu1 %v269_v1, %s236_s0  ;;  %93 = vrot.lane.b32.xlu0 %v267_v0, %s236_s0 }
  0x23   :  { %111 = vrot.lane.b32.xlu1 %v267_v0, %s237_s24  ;;  %109 = vrot.lane.b32.xlu0 %v269_v1, %s237_s24 }
  0x27   :  { %126 = vrot.lane.b32.xlu1 %v269_v1, %s238_s25  ;;  %123 = vrot.lane.b32.xlu0 %v267_v0, %s238_s25 }
  0x85   :  { %v57_v4 = vpop.permute.xlu0 %56  ;;  %v68_v5 = vpop.permute.xlu1 %67 }
  0x89   :  { %v70_v7 = vpop.permute.xlu1 %69  ;;  %v61_v10 = vpop.permute.xlu0 %60 }
  0x8a   :  { %v72_v15 = vsel %vm71_vm0, %v68_v5, %v70_v7  ;;  %v76_v16 = vsel %vm71_vm0, %v70_v7, %v68_v5  ;;  %v63_v17 = vsel %vm62_vm1, %v61_v10, %v57_v4  ;;  %v66_v18 = vsel %vm62_vm1, %v57_v4, %v61_v10 }
  0x8b   :  { %v77_v19 = vsel %vm283_vm2, %v66_v18, %v72_v15  ;;  %v78_v20 = vsel %vm287_vm3, %v63_v17, %v76_v16 }
  0x8c   :  { %v79_v33 = vmul.f32 4.8, %v77_v19  ;;  %v80_v34 = vmul.f32 4.8, %v78_v20 }
  0x8d   :  { %v86_v13 = vpop.permute.xlu1 %85  ;;  %v84_v14 = vpop.permute.xlu0 %83 }
  0x8e   :  { %v88_v25 = vsel %vm87_vm4, %v84_v14, %v86_v13  ;;  %v92_v26 = vsel %vm87_vm4, %v86_v13, %v84_v14 }
  0x91   :  { %v97_v21 = vpop.permute.xlu1 %96  ;;  %v94_v22 = vpop.permute.xlu0 %93 }
  0x92   :  { %v99_v27 = vsel %vm98_vm5, %v97_v21, %v94_v22  ;;  %v102_v28 = vsel %vm98_vm5, %v94_v22, %v97_v21 }
  0x93   :  { %v103_v29 = vsel %vm81_vm6, %v88_v25, %v102_v28  ;;  %v104_v30 = vsel %vm82_vm7, %v92_v26, %v99_v27 }
  0x94   :  { %v105_v31 = vmul.f32 20.8, %v103_v29  ;;  %v106_v32 = vmul.f32 20.8, %v104_v30 }
  0x95   :  { %v112_v35 = vpop.permute.xlu1 %111  ;;  %v110_v36 = vpop.permute.xlu0 %109 }
  0x96   :  { %v114_v38 = vsel %vm113_vm8, %v110_v36, %v112_v35  ;;  %v118_v39 = vsel %vm113_vm8, %v112_v35, %v110_v36  ;;  %v107_v42 = vadd.f32 %v105_v31, %v79_v33  ;;  %v108_v43 = vadd.f32 %v106_v32, %v80_v34 }
  0x97   :  { %v119_v44 = vmul.f32 8.8, %v114_v38  ;;  %v120_v45 = vmul.f32 8.8, %v118_v39 }
  0x99   :  { %v127_v46 = vpop.permute.xlu1 %126  ;;  %v124_v47 = vpop.permute.xlu0 %123  ;;  %v121_v55 = vadd.f32 %v119_v44, %v107_v42  ;;  %v122_v56 = vadd.f32 %v120_v45, %v108_v43 }
  0x9a   :  { %v129_v51 = vsel %vm128_vm9, %v127_v46, %v124_v47  ;;  %v132_v52 = vsel %vm128_vm9, %v124_v47, %v127_v46 }
  0x9b   :  { %v133_v57 = vmul.f32 16.8, %v132_v52  ;;  %v134_v58 = vmul.f32 16.8, %v129_v51 }
  0x9d   :  { %v135_v59 = vadd.f32 %v133_v57, %v121_v55  ;;  %v136_v60 = vadd.f32 %v134_v58, %v122_v56 }
  0x9f   :  { %v143_v63 = vadd.f32 %v141_v53, %v135_v59  ;;  %v144_v0 = vadd.f32 %v142_v50, %v136_v60 }
  0xa1   :  { %v157_v2 = vadd.f32 %v150_v61, %v143_v63  ;;  %v158_v3 = vadd.f32 %v154_v62, %v144_v0 }
  0xa3   :  { %159 = vst [vmem:[#allocation5] sm:$0xff] %v157_v2  ;;  %160 = vst [vmem:[#allocation5 + $0x8] sm:$0xff] %v158_v3 }
  0xa4   :  { %217 = shalt.err (!%p214_p12)
}
  0xa5   :  { %s218_s4 = scalar_lea.hbm %s318_s2, 256 }
  0xa6   :  { %p219_p13 = scmp.ne.s32.totalorder %s318_s2, %s218_s4  ;;  %p222_p0 = scmp.lt.u32.totalorder %s218_s4, %s318_s2 }
  0xa8   :  { %p224_p1 = pnand %p222_p0, %p219_p13 }
  0xaa   :  { %227 = shalt.err (!%p224_p1)
}
  0xab   :  { %170 = dma.vmem_to_hbm [thread:$0]  %s168_s29, 256, %s318_s2, [#allocation4]  }
  0xac   :  { %230 = dma.done.wait [#allocation4], 256  }
  0xad   :  { %231 = vsyncadd [#allocation4], 4294967040 }
  0xae   :  { %174 = vsyncpa [#allocation3], 1 }
  0xaf   :  { %175 = vsyncpa [#allocation4], 1 }

</bundles_post_ra>
